<compile_context>
chip_gen: v7x
topology: tpu7x:2x2x1
jax: 0.10.0
libtpu: 0.0.40
codegen_flags: <defaults>
</compile_context>

<pallas_src>
import math

import jax
import jax.numpy as jnp
from jax.experimental import pallas as pl
from jax.experimental.pallas import tpu as pltpu


def _round_up(v, m):
    return ((v + m - 1) // m) * m


def _make_fusion_loss_kernel(bs, d, tb, tk):
    """Kernel closing over static sizes; masks only the boundary blocks."""
    mask_rows = (bs % tb) != 0   # last batch block has rows >= bs (x padding / y tail)
    mask_cols = (d % tk) != 0    # last feature block has cols >= d (padding)

    def kernel(x_ref, y_ref, o_ref, acc_ref):
        k = pl.program_id(1)
        nk = pl.num_programs(1)

        # Fresh accumulation for each batch block (scratch is resident across
        # the inner feature axis).
        @pl.when(k == 0)
        def _init():
            acc_ref[...] = jnp.zeros_like(acc_ref)

        x = x_ref[...].astype(jnp.float32)
        y = y_ref[...].astype(jnp.float32)
        diff = x - y

        def accumulate(dd):
            # Sublane-only reduce into the lane-shaped accumulator; the
            # cross-lane reduce happens once per batch block in _finalize.
            acc_ref[...] += jnp.sum(dd * dd, axis=0, keepdims=True)

        if mask_rows or mask_cols:
            b = pl.program_id(0)
            conds = []
            if mask_rows:
                conds.append(b == pl.num_programs(0) - 1)
            if mask_cols:
                conds.append(k == nk - 1)
            is_boundary = conds[0]
            for c in conds[1:]:
                is_boundary = jnp.logical_or(is_boundary, c)

            @pl.when(is_boundary)
            def _boundary():
                valid = None
                if mask_rows:
                    rows = jax.lax.broadcasted_iota(jnp.int32, diff.shape, 0) + b * tb
                    valid = rows < bs
                if mask_cols:
                    cols = jax.lax.broadcasted_iota(jnp.int32, diff.shape, 1) + k * tk
                    cmask = cols < d
                    valid = cmask if valid is None else (valid & cmask)
                # Mask BEFORE the square so undefined padding never propagates.
                accumulate(jnp.where(valid, diff, 0.0))

            @pl.when(jnp.logical_not(is_boundary))
            def _interior():
                accumulate(diff)
        else:
            accumulate(diff)

        @pl.when(k == nk - 1)
        def _finalize():
            # (1,1,1) + scalar broadcast, then store the per-batch-block sum.
            o_ref[...] = jnp.zeros_like(o_ref) + jnp.sum(acc_ref[...])

    return kernel


def fusion_loss(x, y, *, block_b=None, block_k=None):
    """Pallas implementation of Fusion_Loss.forward(x, y). Returns scalar f32."""
    bs = x.shape[0]
    assert y.shape[0] >= bs, "y must have at least as many rows as x"

    d = math.prod(x.shape[1:])
    assert math.prod(y.shape[1:]) == d, "x and y must have matching feature size"

    # Reshape only (no slice): keeps both operands as zero-copy views so no
    # extra HBM traffic is generated before the kernel.
    x2 = x.reshape(bs, d)
    y2 = y.reshape(y.shape[0], d)

    max_item = max(x2.dtype.itemsize, y2.dtype.itemsize)
    min_item = min(x2.dtype.itemsize, y2.dtype.itemsize)
    # Sublane multiple: 8 for 32-bit, 16 for bf16, 32 for int8/fp8 (packed rows).
    sub_mult = max(8, 32 // max(1, min_item))

    # --- VMEM budget (per generation) ----------------------------------------
    try:
        vmem_cap = int(pltpu.get_tpu_info().vmem_capacity_bytes)
    except Exception:
        vmem_cap = 64 * 1024 * 1024  # conservative: assume v7x-sized VMEM
    if vmem_cap >= 96 * 1024 * 1024:       # v5e / v6e: 128 MiB physical
        tile_target = 8 * 1024 * 1024      # 8 MiB x 2 inputs x 2 buffers = 32 MiB
        vmem_limit = 64 * 1024 * 1024
    else:                                  # v7x: 64 MiB physical
        tile_target = 4 * 1024 * 1024      # 4 MiB x 2 inputs x 2 buffers = 16 MiB
        vmem_limit = 44 * 1024 * 1024

    # --- batch (sublane) block ------------------------------------------------
    if block_b is None:
        if bs >= 2 * sub_mult:
            # At least 2 batch blocks so v7x's two TensorCores both get work.
            block_b = min(256, _round_up(pl.cdiv(bs, 2), sub_mult))
        else:
            block_b = sub_mult
    block_b = max(sub_mult, _round_up(block_b, sub_mult))

    # --- feature (lane) block ---------------------------------------------------
    if block_k is None:
        target = max(128, tile_target // max(1, block_b * max_item))
        block_k = d if d <= target else (target // 128) * 128
    block_k = min(block_k, d)

    nb = pl.cdiv(bs, block_b)
    nk = pl.cdiv(d, block_k)

    kernel = _make_fusion_loss_kernel(bs, d, block_b, block_k)

    bytes_accessed = bs * d * (x2.dtype.itemsize + y2.dtype.itemsize) + 4 * nb
    cost = pl.CostEstimate(flops=3 * bs * d, transcendentals=0,
                           bytes_accessed=bytes_accessed)

    partials = pl.pallas_call(
        kernel,
        out_shape=jax.ShapeDtypeStruct((nb, 1, 1), jnp.float32),
        grid_spec=pltpu.PrefetchScalarGridSpec(
            num_scalar_prefetch=0,
            grid=(nb, nk),
            in_specs=[
                pl.BlockSpec((block_b, block_k), lambda b, k: (b, k)),
                pl.BlockSpec((block_b, block_k), lambda b, k: (b, k)),
            ],
            out_specs=pl.BlockSpec((1, 1, 1), lambda b, k: (b, 0, 0)),
            scratch_shapes=[pltpu.VMEM((1, block_k), jnp.float32)],
        ),
        compiler_params=pltpu.CompilerParams(
            dimension_semantics=("parallel", "arbitrary"),
            vmem_limit_bytes=vmem_limit,
        ),
        cost_estimate=cost,
    )(x2, y2)

    # Tiny epilogue: sum the per-batch-block partials (nb scalars) in plain JAX.
    return jnp.sum(partials)


if __name__ == "__main__":
    key = jax.random.PRNGKey(0)
    kx, ky = jax.random.split(key)

    # Small shapes: batch=2, channels=4, spatial=16 -> D = 1024.
    bs, C, H, W = 2, 4, 16, 16
    x = jax.random.normal(kx, (bs, C, H, W), jnp.float32)
    # y has a larger batch so the module's y[:x.shape[0]] slice semantics are
    # exercised (handled purely by the grid + row mask, no HBM copy of y).
    y = jax.random.normal(ky, (bs + 2, C, H, W), jnp.float32)

    ref = jnp.sum(jnp.square(jnp.abs(x - y[:bs])))

    # 1) block_k=256 -> 4 feature steps: exercises pipelined accumulation plus
    #    the gated row-mask path (bs=2 < block_b=8).
    loss = fusion_loss(x, y, block_k=256)
    jax.block_until_ready(loss)
    assert jnp.allclose(loss, ref, rtol=1e-4, atol=1e-4), (loss, ref)

    # 2) Auto tile selection (block_k == D, single feature step).
    loss_auto = fusion_loss(x, y)
    jax.block_until_ready(loss_auto)
    assert jnp.allclose(loss_auto, ref, rtol=1e-4, atol=1e-4), (loss_auto, ref)

    # 3) Feature dim not a multiple of 128 (D = 300): boundary feature + batch
    #    blocks are masked in-kernel.
    x3 = jax.random.normal(kx, (3, 3, 10, 10), jnp.float32)
    y3 = jax.random.normal(ky, (5, 3, 10, 10), jnp.float32)
    loss3 = fusion_loss(x3, y3, block_k=128)
    jax.block_until_ready(loss3)
    ref3 = jnp.sum(jnp.square(jnp.abs(x3 - y3[:3])))
    assert jnp.allclose(loss3, ref3, rtol=1e-4, atol=1e-4), (loss3, ref3)

    print("KERNEL_OK")
</pallas_src>

<mosaic_0001>
module attributes {stable_mosaic.version = 11 : i64} {
  func.func @kernel(%arg0: i32, %arg1: i32, %arg2: memref<8x256xf32, #tpu.memory_space<vmem>>, %arg3: memref<8x256xf32, #tpu.memory_space<vmem>>, %arg4: memref<1x1x1xf32, #tpu.memory_space<vmem>>, %arg5: memref<1x256xf32, #tpu.memory_space<vmem>>) attributes {dimension_semantics = [#tpu.dimension_semantics<parallel>, #tpu.dimension_semantics<arbitrary>], iteration_bounds = array<i64: 1, 4>, scalar_prefetch = 0 : i64, scratch_operands = 1 : i64, tpu.core_type = #tpu.core_type<tc>, window_params = [{transform_indices = @transform_0, window_bounds = array<i64: 8, 256>}, {transform_indices = @transform_1, window_bounds = array<i64: 8, 256>}, {transform_indices = @transform_2, window_bounds = array<i64: 1, 1, 1>}]} {
    %c0_i32 = arith.constant 0 : i32
    %0 = arith.cmpi eq, %arg1, %c0_i32 : i32
    %1 = arith.extui %0 : i1 to i32
    %c0_i32_0 = arith.constant 0 : i32
    %2 = arith.cmpi ne, %1, %c0_i32_0 : i32
    scf.if %2 {
      %cst = arith.constant 0.000000e+00 : f32
      %15 = vector.broadcast %cst : f32 to vector<1x256xf32>
      %c0_8 = arith.constant 0 : index
      %c0_9 = arith.constant 0 : index
      %16 = vector.load %arg5[%c0_8, %c0_9] : memref<1x256xf32, #tpu.memory_space<vmem>>, vector<1x256xf32>
      tpu.vector_store %arg5[%c0_8, %c0_9], %15 {strides = array<i32>} : memref<1x256xf32, #tpu.memory_space<vmem>>, vector<1x256xf32>,
    } else {
    }
    %c0 = arith.constant 0 : index
    %c0_1 = arith.constant 0 : index
    %3 = vector.load %arg2[%c0, %c0_1] : memref<8x256xf32, #tpu.memory_space<vmem>>, vector<8x256xf32>
    %c0_2 = arith.constant 0 : index
    %c0_3 = arith.constant 0 : index
    %4 = vector.load %arg3[%c0_2, %c0_3] : memref<8x256xf32, #tpu.memory_space<vmem>>, vector<8x256xf32>
    %5 = arith.subf %3, %4 : vector<8x256xf32>
    %c0_i32_4 = arith.constant 0 : i32
    %6 = arith.cmpi eq, %arg0, %c0_i32_4 : i32
    %7 = arith.extui %6 : i1 to i32
    %c0_i32_5 = arith.constant 0 : i32
    %8 = arith.cmpi ne, %7, %c0_i32_5 : i32
    scf.if %8 {
      %15 = tpu.iota {dimensions = array<i32: 0>} : vector<8x256xi32>
      %c8_i32 = arith.constant 8 : i32
      %16 = arith.muli %arg0, %c8_i32 : i32
      %17 = vector.broadcast %16 : i32 to vector<8x256xi32>
      %18 = arith.addi %15, %17 : vector<8x256xi32>
      %c2_i32 = arith.constant 2 : i32
      %19 = vector.broadcast %c2_i32 : i32 to vector<8x256xi32>
      %20 = arith.cmpi slt, %18, %19 : vector<8x256xi32>
      %cst = arith.constant 0.000000e+00 : f32
      %21 = vector.broadcast %cst : f32 to vector<8x256xf32>
      %22 = arith.select %20, %5, %21 : vector<8x256xi1>, vector<8x256xf32>
      %c0_8 = arith.constant 0 : index
      %c0_9 = arith.constant 0 : index
      %23 = vector.load %arg5[%c0_8, %c0_9] : memref<1x256xf32, #tpu.memory_space<vmem>>, vector<1x256xf32>
      %24 = arith.mulf %22, %22 : vector<8x256xf32>
      %cst_10 = arith.constant dense<0.000000e+00> : vector<256xf32>
      %25 = vector.multi_reduction <add>, %24, %cst_10 [0] : vector<8x256xf32> to vector<256xf32>
      %26 = vector.shape_cast %25 : vector<256xf32> to vector<1x256xf32>
      %27 = arith.addf %23, %26 : vector<1x256xf32>
      %c0_11 = arith.constant 0 : index
      %c0_12 = arith.constant 0 : index
      %28 = vector.load %arg5[%c0_11, %c0_12] : memref<1x256xf32, #tpu.memory_space<vmem>>, vector<1x256xf32>
      tpu.vector_store %arg5[%c0_11, %c0_12], %27 {strides = array<i32>} : memref<1x256xf32, #tpu.memory_space<vmem>>, vector<1x256xf32>,
    } else {
    }
    %true = arith.constant true
    %9 = arith.xori %6, %true : i1
    %10 = arith.extui %9 : i1 to i32
    %c0_i32_6 = arith.constant 0 : i32
    %11 = arith.cmpi ne, %10, %c0_i32_6 : i32
    scf.if %11 {
      %c0_8 = arith.constant 0 : index
      %c0_9 = arith.constant 0 : index
      %15 = vector.load %arg5[%c0_8, %c0_9] : memref<1x256xf32, #tpu.memory_space<vmem>>, vector<1x256xf32>
      %16 = arith.mulf %5, %5 : vector<8x256xf32>
      %cst = arith.constant dense<0.000000e+00> : vector<256xf32>
      %17 = vector.multi_reduction <add>, %16, %cst [0] : vector<8x256xf32> to vector<256xf32>
      %18 = vector.shape_cast %17 : vector<256xf32> to vector<1x256xf32>
      %19 = arith.addf %15, %18 : vector<1x256xf32>
      %c0_10 = arith.constant 0 : index
      %c0_11 = arith.constant 0 : index
      %20 = vector.load %arg5[%c0_10, %c0_11] : memref<1x256xf32, #tpu.memory_space<vmem>>, vector<1x256xf32>
      tpu.vector_store %arg5[%c0_10, %c0_11], %19 {strides = array<i32>} : memref<1x256xf32, #tpu.memory_space<vmem>>, vector<1x256xf32>,
    } else {
    }
    %c3_i32 = arith.constant 3 : i32
    %12 = arith.cmpi eq, %arg1, %c3_i32 : i32
    %13 = arith.extui %12 : i1 to i32
    %c0_i32_7 = arith.constant 0 : i32
    %14 = arith.cmpi ne, %13, %c0_i32_7 : i32
    scf.if %14 {
      %cst = arith.constant 0.000000e+00 : f32
      %15 = vector.broadcast %cst : f32 to vector<1x1x1xf32>
      %c0_8 = arith.constant 0 : index
      %c0_9 = arith.constant 0 : index
      %16 = vector.load %arg5[%c0_8, %c0_9] : memref<1x256xf32, #tpu.memory_space<vmem>>, vector<1x256xf32>
      %17 = vector.shape_cast %16 : vector<1x256xf32> to vector<1x1x256xf32>
      %cst_10 = arith.constant dense<0.000000e+00> : vector<1xf32>
      %18 = vector.multi_reduction <add>, %17, %cst_10 [1, 2] : vector<1x1x256xf32> to vector<1xf32>
      %19 = vector.shape_cast %18 : vector<1xf32> to vector<1x1x1xf32>
      %20 = vector.extract %19[0, 0, 0] : f32 from vector<1x1x1xf32>
      %21 = vector.broadcast %20 : f32 to vector<1x1x1xf32>
      %22 = arith.addf %15, %21 : vector<1x1x1xf32>
      %c0_11 = arith.constant 0 : index
      %c0_12 = arith.constant 0 : index
      %c0_13 = arith.constant 0 : index
      %23 = vector.load %arg4[%c0_11, %c0_12, %c0_13] : memref<1x1x1xf32, #tpu.memory_space<vmem>>, vector<1x1x1xf32>
      tpu.vector_store %arg4[%c0_11, %c0_12, %c0_13], %22 {strides = array<i32>} : memref<1x1x1xf32, #tpu.memory_space<vmem>>, vector<1x1x1xf32>,
    } else {
    }
    return
  }
  func.func @transform_0(%arg0: i32, %arg1: i32) -> (i32, i32) {
    %c0_i32 = arith.constant 0 : i32
    return %arg0, %arg1 : i32, i32
  }
  func.func @transform_1(%arg0: i32, %arg1: i32) -> (i32, i32) {
    %c0_i32 = arith.constant 0 : i32
    return %arg0, %arg1 : i32, i32
  }
  func.func @transform_2(%arg0: i32, %arg1: i32) -> (i32, i32, i32) {
    %c0_i32 = arith.constant 0 : i32
    %c0_i32_0 = arith.constant 0 : i32
    %c0_i32_1 = arith.constant 0 : i32
    return %arg0, %c0_i32, %c0_i32_0 : i32, i32, i32
  }
}

</mosaic_0001>

<bundles_post_ra>
// kernel: tpu_custom_call.1
= control target key start
LH: loop header
LB: loop body
LE: loop exit
PB: predicated region body
PF: predicated region fallthrough
CT: control target
= control target key end

     0   :  { %7 = vsyncpa [#allocation4], 0  ;;  %s977_s0 = inlined_call_operand.hbm [shape: f32[2,1024], index: 0, kind: input, shape index: {}]   ;;  %s978_s1 = inlined_call_operand.hbm [shape: f32[4,1024], index: 1, kind: input, shape index: {}]   ;;  %s979_s2 = inlined_call_operand.hbm [shape: f32[1,1,1], index: 2, kind: output, shape index: {}]  }
   0x1   :  { %9 = vsyncpa [#allocation4 + $0x1], 0 }
   0x2   :  { %10 = vsyncpa [#allocation7], 0 }
   0x3   :  { %12 = vsyncpa [#allocation7 + $0x1], 0 }
   0x4   :  { %13 = vsyncpa [#allocation5], 0  ;;  %s805_s9 = smov 0   ;;  %s807_s10 = smov 0  }
   0x5   :  { %s809_s11 = smov 0   ;;  %s811_s12 = smov 0  }
   0x6   :  { %s813_s13 = smov 0   ;;  %s815_s14 = smov 0  }
   0x7 LB: > { %s554_s15 = sadd.s32 4294967295, %s776_s14   ;;  %s28_s16 = sadd.s32 1, %s772_s13  ;;  %s776_s14 = sphi %s815_s14, %s19_s14   ;;  %s772_s13 = sphi %s813_s13, %s987_s13   ;;  %s768_s12 = sphi %s811_s12, %s986_s12   ;;  %s764_s11 = sphi %s809_s11, %s985_s11   ;;  %s760_s10 = sphi %s807_s10, %s984_s10   ;;  %s756_s9 = sphi %s805_s9, %s983_s9  }
   0x8   : > { %p29_p0 = scmp.ge.s32.totalorder %s28_s16, 4  ;;  %s40_s17 = sadd.s32 1, %s764_s11 }
   0x9   : > { %p47_p1 = scmp.ne.s32.totalorder %s764_s11, %s760_s10  ;;  %p48_p2 = scmp.eq.s32.totalorder %s776_s14, 0 }
   0xa   : > { %s989_s16 = smov (%p29_p0, %s28_s16), 0  ;;  %p53_p4 = scmp.ne.s32.totalorder %s760_s10, %s756_s9 }
   0xb   : > { %p841_p3 = por %p48_p2, %p47_p1  ;;  %s36_s19 = ssub.s32 %s772_s13, %s989_s16 }
   0xc   : > { %p54_p5 = scmp.eq.s32.totalorder %s554_s15, 0  ;;  %p38_p6 = scmp.eq.s32.totalorder %s36_s19, 0 }
   0xd   : > { %p556_p8 = scmp.ge.s32.totalorder %s776_s14, 4 }
   0xe   : > { %p850_p7 = por %p54_p5, %p53_p4 }
   0xf   : > { %s855_s21 = scalar_select %p38_p6, %s764_s11, %s40_s17  }
  0x10   : > { %127 = sbr.rel (%p556_p8) target bundleno = 87 (0x57), region = 16 }
  0x17   : > { %130 = sbr.rel (!%p841_p3) target bundleno = 55 (0x37), region = 20  ;;  %s131_s22 = sand.u32 (%p841_p3), 1, %s764_s11  }
  0x18   : > { %s557_s23 = sshll.u32 (%p841_p3), %s131_s22, 4  ;;  %s861_s24 = scalar_lea.sflag (%p841_p3), [#allocation4], %s131_s22 }
  0x19   : > { %s135_s25 = scalar_lea.vmem (%p841_p3), [#allocation3], %s557_s23 }
  0x1e   : > { %143 = vsyncadd %s861_s24, 192  ;;  %s574_s26 = sshll.u32 %s772_s13, 6  ;;  %s150_s27 = sshll.u32 %s135_s25, 4  ;;  %s870_s27 = int_to_ptr.vmem [resolvable:$true] %s150_s27 }
  0x1f   : > { %s868_s30 = scalar_lea.hbm %s977_s0, %s574_s26  ;;  %s646_s6 = scalar_lea.hbm %s977_s0, 256 }
  0x20   : > { %s644_s3 = scalar_lea.hbm %s868_s30, 64  ;;  %p647_p10 = scmp.lt.u32.totalorder %s868_s30, %s977_s0 }
  0x21   : > { %p645_p9 = scmp.ne.s32.totalorder %s868_s30, %s644_s3  ;;  %p648_p11 = scmp.lt.u32.totalorder %s646_s6, %s644_s3 }
  0x22   : > { %p650_p13 = scmp.lt.u32.totalorder %s644_s3, %s868_s30 }
  0x23   : > { %p649_p12 = por %p648_p11, %p647_p10 }
  0x25   : > { %p651_p0 = por %p650_p13, %p649_p12 }
  0x27   : > { %p652_p1 = pnand %p651_p0, %p645_p9 }
  0x29   : > { %655 = shalt.err (!%p652_p1)
}
  0x2a   : > { %s656_s9 = scalar_lea.vmem %s870_s27, 64  ;;  %s778_s17 = smov [#allocation3]  }
  0x2b   : > { %p657_p2 = scmp.ne.s32.totalorder %s870_s27, %s656_s9  ;;  %s658_s19 = sshll.u32 %s778_s17, 4  ;;  %s659_s19 = int_to_ptr.vmem [resolvable:$false] %s658_s19 }
  0x2c   : > { %s660_s22 = scalar_lea.vmem %s659_s19, 512  ;;  %p661_p4 = scmp.lt.s32.totalorder %s870_s27, %s659_s19 }
  0x2d   : > { %p662_p5 = scmp.lt.s32.totalorder %s660_s22, %s656_s9 }
  0x2f   : > { %p663_p6 = por %p662_p5, %p661_p4 }
  0x31   : > { %p664_p8 = pnand %p663_p6, %p657_p2 }
  0x33   : > { %667 = shalt.err (!%p664_p8)
}
  0x34   : > { %s779_s23 = smov 256   ;;  %s780_s25 = smov 64  }
  0x35   : > { %s781_s26 = smov 4  }
  0x36   : > { %156 = dma.hbm_to_vmem [thread:$0]  %s868_s30, 64, %s870_s27, %s861_s24, %s779_s23, %s780_s25, %s781_s26  }
  0x37 PF: > { %159 = sbr.rel (!%p841_p3) target bundleno = 87 (0x57), region = 24  ;;  %s160_s28 = sand.u32 (%p841_p3), 1, %s764_s11  }
  0x38   : > { %s560_s29 = sshll.u32 (%p841_p3), %s160_s28, 4  ;;  %s891_s3 = scalar_lea.sflag (%p841_p3), [#allocation7], %s160_s28 }
  0x39   : > { %s164_s4 = scalar_lea.vmem (%p841_p3), [#allocation6], %s560_s29 }
  0x3e   : > { %172 = vsyncadd %s891_s3, 128  ;;  %s575_s5 = sshll.u32 %s772_s13, 7  ;;  %s179_s6 = sshll.u32 %s164_s4, 4  ;;  %s900_s6 = int_to_ptr.vmem [resolvable:$true] %s179_s6 }
  0x3f   : > { %s898_s9 = scalar_lea.hbm %s978_s1, %s575_s5  ;;  %s670_s30 = scalar_lea.hbm %s978_s1, 512 }
  0x40   : > { %s668_s18 = scalar_lea.hbm %s898_s9, 128  ;;  %p671_p9 = scmp.lt.u32.totalorder %s898_s9, %s978_s1 }
  0x41   : > { %p669_p3 = scmp.ne.s32.totalorder %s898_s9, %s668_s18  ;;  %p672_p10 = scmp.lt.u32.totalorder %s670_s30, %s668_s18 }
  0x42   : > { %p674_p12 = scmp.lt.u32.totalorder %s668_s18, %s898_s9 }
  0x43   : > { %p673_p11 = por %p672_p10, %p671_p9 }
  0x45   : > { %p675_p13 = por %p674_p12, %p673_p11 }
  0x47   : > { %p676_p0 = pnand %p675_p13, %p669_p3 }
  0x49   : > { %679 = shalt.err (!%p676_p0)
}
  0x4a   : > { %s680_s22 = scalar_lea.vmem %s900_s6, 128  ;;  %s782_s23 = smov [#allocation6]  }
  0x4b   : > { %p681_p1 = scmp.ne.s32.totalorder %s900_s6, %s680_s22  ;;  %s682_s25 = sshll.u32 %s782_s23, 4  ;;  %s683_s25 = int_to_ptr.vmem [resolvable:$false] %s682_s25 }
  0x4c   : > { %s684_s26 = scalar_lea.vmem %s683_s25, 512  ;;  %p685_p2 = scmp.lt.s32.totalorder %s900_s6, %s683_s25 }
  0x4d   : > { %p686_p4 = scmp.lt.s32.totalorder %s684_s26, %s680_s22 }
  0x4f   : > { %p687_p5 = por %p686_p4, %p685_p2 }
  0x51   : > { %p688_p6 = pnand %p687_p5, %p681_p1 }
  0x53   : > { %691 = shalt.err (!%p688_p6)
}
  0x54   : > { %s783_s28 = smov 512   ;;  %s784_s29 = smov 128  }
  0x55   : > { %s785_s4 = smov 8  }
  0x56   : > { %185 = dma.hbm_to_vmem [thread:$0]  %s898_s9, 128, %s900_s6, %s891_s3, %s783_s28, %s784_s29, %s785_s4  }
  0x57 PF: > { %p563_p8 = scmp.ge.s32.totalorder %s776_s14, 1  ;;  %p187_p3 = scmp.lt.s32.totalorder %s776_s14, 5 }
  0x59   : > { %p188_p9 = pnand %p563_p8, %p187_p3 }
  0x5a   : > { %s193_s5 = sand.u32 (!%p188_p9), 1, %s760_s10  }
  0x5b   : > { %191 = sbr.rel (%p188_p9) target bundleno = 390 (0x186), region = 28  ;;  %s564_s7 = sshll.u32 (!%p188_p9), %s193_s5, 4 }
  0x5c   : > { %s194_s8 = scalar_lea.sflag (!%p188_p9), [#allocation4], %s193_s5  ;;  %s197_s18 = scalar_lea.vmem (!%p188_p9), [#allocation3], %s564_s7 }
  0x62   : > { %743 = dma.done.wait (%p850_p7), %s194_s8, 256  }
  0x63   : > { %745 = vsyncadd (%p850_p7), %s194_s8, 4294967040  ;;  %s203_s3 = scalar_lea.sflag [#allocation7], %s193_s5  ;;  %s206_s6 = scalar_lea.vmem [#allocation6], %s564_s7 }
  0x64   : > { %747 = dma.done.wait (%p850_p7), %s203_s3, 256  }
  0x65   : > { %749 = vsyncadd (%p850_p7), %s203_s3, 4294967040  ;;  %p566_p10 = scmp.ne.s32.totalorder %s768_s12, 0 }
  0x66   : > { %v241_v0 = vlaneseq (!%p566_p10)  ;;  %v786_v1 = vmov (!%p566_p10), 0.0  }
  0x67   : > { %240 = sbr.rel (%p566_p10) target bundleno = 110 (0x6e), region = 40 }
  0x68   : > { %vm243_vm0 = vcmp.lt.s32.totalorder (!%p566_p10), %v241_v0, 256 }
  0x69   : > { %245 = vst.msk [vmem:[#allocation2] sm:$0x3] (!%p566_p10), %vm243_vm0, %v786_v1 }
  0x6e PF: > { %v246_v2 = vld [vmem:[%s197_s18] sm:$0xf]  ;;  %v247_v3 = vld [vmem:[%s197_s18 + $0x4] sm:$0xf]  ;;  %v248_v4 = vld [vmem:[%s197_s18 + $0x8] sm:$0xf]  ;;  %v282_v5 = vlaneseq }
  0x6f   : > { %v249_v6 = vld [vmem:[%s197_s18 + $0xc] sm:$0xf]  ;;  %v567_v7 = vld.sshfl [vmem:[%s206_s6] sm:$0xff pattern:$0x76325410]  ;;  %p569_p7 = scmp.ne.s32.totalorder %s768_s12, 3 }
  0x70   : > { %v568_v8 = vld.sshfl [vmem:[%s206_s6 + $0x8] sm:$0xff pattern:$0x76325410]  ;;  %v261_v9 = vcombine.high %v567_v7, %v567_v7  ;;  %v274_v10 = vsub.f32 %v246_v2, %v567_v7  ;;  %v283_v13 = vshrl.u32 %v282_v5, 7  ;;  %v787_v14 = vmov 1983009808  }
  0x71   : > { %v269_v11 = vcombine.high %v568_v8, %v568_v8  ;;  %v276_v12 = vsub.f32 %v248_v4, %v568_v8  ;;  %v295_v15 = vunpack.c.l.s4 %v787_v14  ;;  %v788_v34 = vmov 1966171168   ;;  %v314_v48 = vld [vmem:[#allocation2] sm:$0x3] }
  0x72   : > { %v275_v16 = vsub.f32 %v247_v3, %v261_v9  ;;  %vm287_vm1 = vcmp.lt.s32.totalorder %v283_v13, 2  ;;  %v333_v35 = vunpack.c.l.s4 %v788_v34  ;;  %vm350_vm2 = vcmp.lt.s32.totalorder %v282_v5, 256 }
  0x73   : > { %v277_v17 = vsub.f32 %v249_v6, %v269_v11  ;;  %v296_v18 = vunpack.c.0.s8 %v295_v15  ;;  %v430_v52 = vsub.s32 (!%p569_p7), 0, %v283_v13  ;;  %v434_v53 = vsub.s32 (!%p569_p7), 1, %v283_v13 }
  0x74   : > { %v292_v19 = vcombine.low %v274_v10, %v275_v16  ;;  %v334_v40 = vunpack.c.0.s8 %v333_v35  ;;  %vm438_vm3 = vcmask (!%p569_p7), 1040384   ;;  %vm453_vm4 = vcmask (!%p569_p7), 0  }
  0x75   : > { %v293_v20 = vcombine.low %v276_v12, %v277_v17  ;;  %v299_v21 = vsub.s32 %v296_v18, %v283_v13 }
  0x76   : > { %v337_v45 = vsub.s32 %v334_v40, %v283_v13 }
  0x77   : > { %v300_v22 = vrot.slane %v292_v19, %v299_v21  ;;  %v307_v23 = vrot.slane %v293_v20, %v299_v21 }
  0x79   : > { %v308_v24 = vcombine.low %v300_v22, %v307_v23  ;;  %v309_v25 = vcombine.high %v300_v22, %v307_v23 }
  0x7b   : > { %v312_v26 = vsel %vm287_vm1, %v308_v24, 0.0  ;;  %v313_v27 = vsel %vm287_vm1, %v309_v25, 0.0 }
  0x7c   : > { %v315_v28 = vmul.f32 %v312_v26, %v312_v26  ;;  %v316_v29 = vmul.f32 %v313_v27, %v313_v27 }
  0x7e   : > { %v317_v30 = vrot.slane %v315_v28, 4  ;;  %v323_v31 = vrot.slane %v316_v29, 4 }
  0x80   : > { %v318_v32 = vadd.f32 %v317_v30, %v315_v28  ;;  %v324_v33 = vadd.f32 %v323_v31, %v316_v29 }
  0x82   : > { %v319_v36 = vrot.slane %v318_v32, 2  ;;  %v325_v37 = vrot.slane %v324_v33, 2 }
  0x84   : > { %v320_v38 = vadd.f32 %v319_v36, %v318_v32  ;;  %v326_v39 = vadd.f32 %v325_v37, %v324_v33 }
  0x86   : > { %v321_v41 = vrot.slane %v320_v38, 1  ;;  %v327_v42 = vrot.slane %v326_v39, 1 }
  0x88   : > { %v322_v43 = vadd.f32 %v321_v41, %v320_v38  ;;  %v328_v44 = vadd.f32 %v327_v42, %v326_v39 }
  0x8a   : > { %v331_v46 = vcombine.low %v322_v43, %v328_v44 }
  0x8c   : > { %v338_v47 = vrot.slane %v331_v46, %v337_v45  ;;  %425 = sbr.rel (%p569_p7) target bundleno = 365 (0x16d), region = 52 }
  0x8e   : > { %v345_v49 = vrot.slane %v338_v47, %v337_v45 }
  0x90   : > { %v347_v50 = vadd.f32 %v345_v49, %v314_v48 }
  0x92   : > { %352 = vst.msk [vmem:[#allocation2] sm:$0x3] %vm350_vm2, %v347_v50 }
  0x99   : > { %v426_v51 = vld [vmem:[#allocation2] sm:$0x3] }
  0x9a   : > { %v431_v54 = vrot.slane %v426_v51, %v430_v52  ;;  %v435_v55 = vrot.slane %v426_v51, %v434_v53 }
  0x9c   : > { %v439_v56 = vsel %vm438_vm3, %v431_v54, 0.0  ;;  %v440_v57 = vsel %vm438_vm3, %v435_v55, 0.0 }
  0x9d   : > { %v441_v58 = vadd.f32 %v440_v57, %v439_v56 }
  0x9f   : > { %442 = vadd.xlane.f32.xlu0 %v441_v58 }
 0x12c   : > { %v443_v59 = vpop.xlane.xlu0 %442 }
 0x12d   : > { %v444_v60 = vrot.slane %v443_v59, 4 }
 0x12f   : > { %v445_v61 = vadd.f32 %v444_v60, %v443_v59 }
 0x131   : > { %v446_v62 = vrot.slane %v445_v61, 2 }
 0x133   : > { %v447_v63 = vadd.f32 %v446_v62, %v445_v61 }
 0x135   : > { %v448_v0 = vrot.slane %v447_v63, 1 }
 0x137   : > { %v449_v1 = vadd.f32 %v448_v0, %v447_v63 }
 0x139   : > { %576 = vpush %v449_v1 }
 0x16a   : > { %s577_s12 = spop %576 }
 0x16b   : > { %v451_v2 = vstv %s577_s12 }
 0x16c   : > { %454 = vst.msk [vmem:[#allocation8] sm:$0x1] %vm453_vm4, %v451_v2 }
 0x16d PF: > { %p933_p11 = scmp.eq.s32.totalorder %s554_s15, 3  ;;  %s789_s9 = smov [#allocation8]  }
 0x16e   : > { %s464_s24 = sshll.u32 %s789_s9, 4  ;;  %s465_s24 = int_to_ptr.vmem [resolvable:$true] %s464_s24 }
 0x16f   : > { %s692_s27 = scalar_lea.vmem %s465_s24, 16  ;;  %s698_s30 = scalar_lea.vmem %s465_s24, 32 }
 0x170   : > { %p693_p12 = scmp.ne.s32.totalorder %s465_s24, %s692_s27  ;;  %p699_p1 = scmp.lt.s32.totalorder %s465_s24, %s465_s24 }
 0x171   : > { %p700_p2 = scmp.lt.s32.totalorder %s698_s30, %s692_s27 }
 0x172   : > { %p694_p13 = pnand %p693_p12, %p933_p11 }
 0x173   : > { %p701_p4 = por %p700_p2, %p699_p1 }
 0x174   : > { %p695_p0 = pneg %p694_p13 }
 0x176   : > { %p702_p5 = pnand %p701_p4, %p695_p0 }
 0x178   : > { %705 = shalt.err (!%p702_p5)
}
 0x179   : > { %s706_s19 = scalar_lea.hbm %s979_s2, 16 }
 0x17a   : > { %p707_p6 = scmp.ne.s32.totalorder %s979_s2, %s706_s19  ;;  %p712_p9 = scmp.lt.u32.totalorder %s706_s19, %s979_s2 }
 0x17c   : > { %p708_p8 = pnand %p707_p6, %p933_p11 }
 0x17e   : > { %p709_p3 = pneg %p708_p8 }
 0x180   : > { %p714_p10 = pnand %p712_p9, %p709_p3 }
 0x182   : > { %717 = shalt.err (!%p714_p10)
}
 0x183   : > { %581 = dma.vmem_to_hbm [thread:$0]  (%p933_p11), %s465_s24, 16, %s979_s2, [#allocation5]  }
 0x184   : > { %751 = dma.done.wait (%p933_p11), [#allocation5], 16  }
 0x185   : > { %753 = vsyncadd (%p933_p11), [#allocation5], 4294967280 }
 0x186 PF: > { %s19_s14 = sadd.s32 1, %s776_s14   ;;  %s983_s9 = smov %s760_s10 }
 0x187   : > { %p16_p7 = scmp.ge.s32.totalorder %s19_s14, 6   ;;  %s984_s10 = smov %s764_s11 }
 0x188   : > { %s985_s11 = smov %s855_s21  ;;  %s986_s12 = smov %s772_s13 }
 0x189   : > { %s987_s13 = smov %s989_s16  ;;  %18 = sbr.rel (!%p16_p7) target bundleno = 7 (0x7), region = 95 }
 0x190   :  { %477 = vsyncpa [#allocation4], 1 }
 0x191   :  { %479 = vsyncpa [#allocation4 + $0x1], 1 }
 0x192   :  { %480 = vsyncpa [#allocation7], 1 }
 0x193   :  { %482 = vsyncpa [#allocation7 + $0x1], 1 }
 0x194   :  { %483 = vsyncpa [#allocation5], 1 }
 0x195   :  { %485 = vsyncpa [#allocation5 + $0x1], 1 }

</bundles_post_ra>
